<compile_context>
chip_gen: v6e
topology: v6e:2x2x1
jax: 0.10.0
libtpu: 0.0.40
codegen_flags: <defaults>
</compile_context>

<pallas_src>
import functools

import jax
import jax.numpy as jnp
from jax.experimental import pallas as pl
from jax.experimental.pallas import tpu as pltpu

_VMEM = pltpu.MemorySpace.VMEM
_SMEM = pltpu.MemorySpace.SMEM


# ------------------------------ fused kernel ------------------------------

def _make_fused_rqvae_kernel(n_enc, n_vq, n_dec, loss_beta):
    """Builds the fused forward kernel for a fixed layer/codebook structure."""

    def kernel(*refs):
        # ---- unpack refs (inputs first, then outputs) ----
        p = 0
        x_ref = refs[p]; p += 1
        enc = [(refs[p + 2 * i], refs[p + 2 * i + 1]) for i in range(n_enc)]
        p += 2 * n_enc
        vq = [(refs[p + 2 * i], refs[p + 2 * i + 1]) for i in range(n_vq)]
        p += 2 * n_vq
        dec = [(refs[p + 2 * i], refs[p + 2 * i + 1]) for i in range(n_dec)]
        p += 2 * n_dec
        xhat_ref, sid_ref, recon_ref, rqloss_ref = refs[p:p + 4]

        x = x_ref[...].astype(jnp.float32)
        B = x.shape[0]

        # ---- encoder: Linear + ReLU stages (incl. final stage to latent) ----
        z = x
        for w_ref, b_ref in enc:
            y = jnp.dot(z, w_ref[...], preferred_element_type=jnp.float32)
            z = jnp.maximum(y + b_ref[...], 0.0)          # b is (1, out)

        # ---- residual vector quantization ----
        res = z                                           # running residual
        agg = jnp.zeros_like(z)                           # running vq aggregate
        iota_cache = {}                                   # hoist col iota per K
        lane = jax.lax.broadcasted_iota(jnp.int32, (B, n_vq), 1)
        sid_mat = jnp.zeros((B, n_vq), jnp.int32)

        for level, (cb_ref, emb_ref) in enumerate(vq):
            cb = cb_ref[...]                              # (K, D) distance codebook
            emb = emb_ref[...]                            # (K, D) nn.Embedding table
            K = cb.shape[0]
            if K not in iota_cache:
                iota_cache[K] = jax.lax.broadcasted_iota(jnp.int32, (B, K), 1)
            col = iota_cache[K]

            # L2 branch of VQEmbedding._compute_distances:
            #   dist = ||x||^2 + ||c||^2 - 2 * x @ c^T
            # dot_general contracts the feature axis of both operands directly,
            # avoiding an explicit transpose of cb.
            data_sq = jnp.sum(res * res, axis=-1, keepdims=True)        # (B, 1)
            cb_sq = jnp.sum(cb * cb, axis=-1)[None, :]                  # (1, K)
            dots = jax.lax.dot_general(
                res, cb, dimension_numbers=(((1,), (1,)), ((), ())),
                preferred_element_type=jnp.float32)                     # (B, K)
            dist = data_sq + cb_sq - 2.0 * dots

            # argmin over codebook axis (first index on ties, like torch.argmin)
            min_d = jnp.min(dist, axis=-1, keepdims=True)
            idx = jnp.min(jnp.where(dist == min_d, col, jnp.int32(K)),
                          axis=-1, keepdims=True)                       # (B, 1)
            sid_mat = jnp.where(lane == level, idx, sid_mat)

            # Embedding lookup via one-hot @ emb (rides the MXU).  NOTE: matches
            # the PyTorch quirk that _update_emb uses the nn.Embedding's own
            # weight table (emb), NOT the freshly created self.codebook (cb).
            onehot = (col == idx).astype(jnp.float32)                   # (B, K)
            vq_emb = jnp.dot(onehot, emb,
                             preferred_element_type=jnp.float32)        # (B, D)

            res = res - vq_emb                                          # res -= vq
            agg = agg + vq_emb                                          # agg += vq

        sid_ref[...] = sid_mat                        # single lane-dense store

        # ---- RQ-VAE loss.  In the PyTorch code res_emb / vq_emb_aggre are
        # mutated in place, so every list entry aliases the FINAL residual /
        # FINAL aggregate; the loss equals
        #   num_codebooks * (1 + beta) * mean((res_final - agg_final)^2).
        d = res - agg
        rq_mse = jnp.sum(d * d) / jnp.float32(d.size)
        rqloss_ref[0, 0] = jnp.float32(n_vq) * (1.0 + loss_beta) * rq_mse

        # ---- decoder on vq_emb_list[-1] (== final aggregate) ----
        h = agg
        for w_ref, b_ref in dec:
            y = jnp.dot(h, w_ref[...], preferred_element_type=jnp.float32)
            h = jnp.maximum(y + b_ref[...], 0.0)
        xhat_ref[...] = h.astype(xhat_ref.dtype)

        # ---- reconstruction loss (fused, no extra HBM reads) ----
        e = h - x
        recon_ref[0, 0] = jnp.sum(e * e) / jnp.float32(e.size)

    return kernel


# -------------------------- parameter init (glue) --------------------------

def init_linear(key, in_dim, out_dim):
    kw, kb = jax.random.split(key)
    bound = 1.0 / jnp.sqrt(jnp.float32(in_dim))   # torch.nn.Linear default init
    w = jax.random.uniform(kw, (in_dim, out_dim), jnp.float32, -bound, bound)
    b = jax.random.uniform(kb, (out_dim,), jnp.float32, -bound, bound)
    return w, b


def init_rqvae_params(key, input_dim, hidden_channels, latent_dim,
                      num_codebooks, codebook_size):
    enc_dims = [input_dim] + list(hidden_channels) + [latent_dim]
    dec_dims = [latent_dim] + list(hidden_channels[::-1]) + [input_dim]
    params = {"enc": [], "dec": [], "vq": []}
    for i in range(len(enc_dims) - 1):
        key, k = jax.random.split(key)
        params["enc"].append(init_linear(k, enc_dims[i], enc_dims[i + 1]))
    for i in range(len(dec_dims) - 1):
        key, k = jax.random.split(key)
        params["dec"].append(init_linear(k, dec_dims[i], dec_dims[i + 1]))
    for i in range(num_codebooks):
        key, kc, ke = jax.random.split(key, 3)
        # kmeans_method not in {"kmeans", "bkmeans"} -> codebook = randn(K, D)
        # TODO(synk): sklearn KMeans / BalancedKmeans codebook init is a
        # host-side, data-dependent sequential algorithm with no clean Pallas
        # equivalent; the random-codebook branch of _create_codebook is used.
        cb = jax.random.normal(kc, (codebook_size[i], latent_dim), jnp.float32)
        emb = jax.random.normal(ke, (codebook_size[i], latent_dim), jnp.float32)
        params["vq"].append((cb, emb))
    return params


# ------------------------------ forward (glue) ------------------------------

@functools.partial(jax.jit, static_argnames=("loss_beta",))
def rqvae_forward(params, x, loss_beta):
    enc, vq, dec = params["enc"], params["vq"], params["dec"]
    n_enc, n_vq, n_dec = len(enc), len(vq), len(dec)
    B, input_dim = x.shape

    inputs = [x]
    for w, b in enc:
        inputs += [w, b.reshape(1, -1)]
    for cb, emb in vq:
        inputs += [cb, emb]
    for w, b in dec:
        inputs += [w, b.reshape(1, -1)]

    kernel = _make_fused_rqvae_kernel(n_enc, n_vq, n_dec, float(loss_beta))

    x_hat, sids, recon, rqloss = pl.pallas_call(
        kernel,
        out_shape=(
            jax.ShapeDtypeStruct((B, input_dim), x.dtype),   # x_hat
            jax.ShapeDtypeStruct((B, n_vq), jnp.int32),      # semantic ids
            jax.ShapeDtypeStruct((1, 1), jnp.float32),       # recon loss
            jax.ShapeDtypeStruct((1, 1), jnp.float32),       # rqvae loss
        ),
        in_specs=[pl.BlockSpec(memory_space=_VMEM)] * len(inputs),
        out_specs=(
            pl.BlockSpec(memory_space=_VMEM),
            pl.BlockSpec(memory_space=_VMEM),
            pl.BlockSpec(memory_space=_SMEM),
            pl.BlockSpec(memory_space=_SMEM),
        ),
    )(*inputs)

    recon_loss = recon[0, 0]
    rqvae_loss = rqloss[0, 0]
    total_loss = recon_loss + rqvae_loss
    return x_hat, sids, recon_loss, rqvae_loss, total_loss


if __name__ == "__main__":
    key = jax.random.PRNGKey(0)
    batch, input_dim = 8, 64
    hidden_channels = [48, 32]
    latent_dim = 16
    num_codebooks = 3
    codebook_size = [12, 12, 12]
    loss_beta = 0.25

    kx, kp = jax.random.split(key)
    x = jax.random.normal(kx, (batch, input_dim), jnp.float32)
    params = init_rqvae_params(kp, input_dim, hidden_channels, latent_dim,
                               num_codebooks, codebook_size)

    outs = rqvae_forward(params, x, loss_beta)
    jax.block_until_ready(outs)
    x_hat, sids, recon_loss, rqvae_loss, total_loss = outs
    assert x_hat.shape == (batch, input_dim)
    assert sids.shape == (batch, num_codebooks)
    assert sids.dtype == jnp.int32
    assert recon_loss.shape == () and rqvae_loss.shape == ()
    print("KERNEL_OK")
</pallas_src>

<mosaic_0001>
module attributes {stable_mosaic.version = 11 : i64} {
  func.func @kernel(%arg0: memref<8x64xf32, #tpu.memory_space<vmem>>, %arg1: memref<64x48xf32, #tpu.memory_space<vmem>>, %arg2: memref<1x48xf32, #tpu.memory_space<vmem>>, %arg3: memref<48x32xf32, #tpu.memory_space<vmem>>, %arg4: memref<1x32xf32, #tpu.memory_space<vmem>>, %arg5: memref<32x16xf32, #tpu.memory_space<vmem>>, %arg6: memref<1x16xf32, #tpu.memory_space<vmem>>, %arg7: memref<12x16xf32, #tpu.memory_space<vmem>>, %arg8: memref<12x16xf32, #tpu.memory_space<vmem>>, %arg9: memref<12x16xf32, #tpu.memory_space<vmem>>, %arg10: memref<12x16xf32, #tpu.memory_space<vmem>>, %arg11: memref<12x16xf32, #tpu.memory_space<vmem>>, %arg12: memref<12x16xf32, #tpu.memory_space<vmem>>, %arg13: memref<16x32xf32, #tpu.memory_space<vmem>>, %arg14: memref<1x32xf32, #tpu.memory_space<vmem>>, %arg15: memref<32x48xf32, #tpu.memory_space<vmem>>, %arg16: memref<1x48xf32, #tpu.memory_space<vmem>>, %arg17: memref<48x64xf32, #tpu.memory_space<vmem>>, %arg18: memref<1x64xf32, #tpu.memory_space<vmem>>, %arg19: memref<8x64xf32, #tpu.memory_space<vmem>>, %arg20: memref<8x3xi32, #tpu.memory_space<vmem>>, %arg21: memref<1x1xf32, #tpu.memory_space<smem>>, %arg22: memref<1x1xf32, #tpu.memory_space<smem>>) attributes {dimension_semantics = [], scalar_prefetch = 0 : i64, scratch_operands = 0 : i64, tpu.core_type = #tpu.core_type<tc>} {
    %c0 = arith.constant 0 : index
    %c0_0 = arith.constant 0 : index
    %0 = vector.load %arg0[%c0, %c0_0] : memref<8x64xf32, #tpu.memory_space<vmem>>, vector<8x64xf32>
    %c0_1 = arith.constant 0 : index
    %c0_2 = arith.constant 0 : index
    %1 = vector.load %arg1[%c0_1, %c0_2] : memref<64x48xf32, #tpu.memory_space<vmem>>, vector<64x48xf32>
    %cst = arith.constant dense<0.000000e+00> : vector<8x48xf32>
    %2 = tpu.matmul %0, %1, %cst {dimension_numbers = #tpu.dot_dimension_numbers<[1], [0], [0], [1], [0, 0, 1, 1], [], []>} : vector<8x64xf32>, vector<64x48xf32>, vector<8x48xf32> -> vector<8x48xf32>
    %c0_3 = arith.constant 0 : index
    %c0_4 = arith.constant 0 : index
    %3 = vector.load %arg2[%c0_3, %c0_4] : memref<1x48xf32, #tpu.memory_space<vmem>>, vector<1x48xf32>
    %4 = vector.broadcast %3 : vector<1x48xf32> to vector<8x48xf32>
    %5 = arith.addf %2, %4 : vector<8x48xf32>
    %cst_5 = arith.constant 0.000000e+00 : f32
    %6 = vector.broadcast %cst_5 : f32 to vector<8x48xf32>
    %7 = arith.maximumf %5, %6 : vector<8x48xf32>
    %c0_6 = arith.constant 0 : index
    %c0_7 = arith.constant 0 : index
    %8 = vector.load %arg3[%c0_6, %c0_7] : memref<48x32xf32, #tpu.memory_space<vmem>>, vector<48x32xf32>
    %cst_8 = arith.constant dense<0.000000e+00> : vector<8x32xf32>
    %9 = tpu.matmul %7, %8, %cst_8 {dimension_numbers = #tpu.dot_dimension_numbers<[1], [0], [0], [1], [0, 0, 1, 1], [], []>} : vector<8x48xf32>, vector<48x32xf32>, vector<8x32xf32> -> vector<8x32xf32>
    %c0_9 = arith.constant 0 : index
    %c0_10 = arith.constant 0 : index
    %10 = vector.load %arg4[%c0_9, %c0_10] : memref<1x32xf32, #tpu.memory_space<vmem>>, vector<1x32xf32>
    %11 = vector.broadcast %10 : vector<1x32xf32> to vector<8x32xf32>
    %12 = arith.addf %9, %11 : vector<8x32xf32>
    %cst_11 = arith.constant 0.000000e+00 : f32
    %13 = vector.broadcast %cst_11 : f32 to vector<8x32xf32>
    %14 = arith.maximumf %12, %13 : vector<8x32xf32>
    %c0_12 = arith.constant 0 : index
    %c0_13 = arith.constant 0 : index
    %15 = vector.load %arg5[%c0_12, %c0_13] : memref<32x16xf32, #tpu.memory_space<vmem>>, vector<32x16xf32>
    %cst_14 = arith.constant dense<0.000000e+00> : vector<8x16xf32>
    %16 = tpu.matmul %14, %15, %cst_14 {dimension_numbers = #tpu.dot_dimension_numbers<[1], [0], [0], [1], [0, 0, 1, 1], [], []>} : vector<8x32xf32>, vector<32x16xf32>, vector<8x16xf32> -> vector<8x16xf32>
    %c0_15 = arith.constant 0 : index
    %c0_16 = arith.constant 0 : index
    %17 = vector.load %arg6[%c0_15, %c0_16] : memref<1x16xf32, #tpu.memory_space<vmem>>, vector<1x16xf32>
    %18 = vector.broadcast %17 : vector<1x16xf32> to vector<8x16xf32>
    %19 = arith.addf %16, %18 : vector<8x16xf32>
    %cst_17 = arith.constant 0.000000e+00 : f32
    %20 = vector.broadcast %cst_17 : f32 to vector<8x16xf32>
    %21 = arith.maximumf %19, %20 : vector<8x16xf32>
    %cst_18 = arith.constant 0.000000e+00 : f32
    %22 = vector.broadcast %cst_18 : f32 to vector<8x16xf32>
    %23 = tpu.iota {dimensions = array<i32: 1>} : vector<8x3xi32>
    %c0_i32 = arith.constant 0 : i32
    %24 = vector.broadcast %c0_i32 : i32 to vector<8x3xi32>
    %c0_19 = arith.constant 0 : index
    %c0_20 = arith.constant 0 : index
    %25 = vector.load %arg7[%c0_19, %c0_20] : memref<12x16xf32, #tpu.memory_space<vmem>>, vector<12x16xf32>
    %c0_21 = arith.constant 0 : index
    %c0_22 = arith.constant 0 : index
    %26 = vector.load %arg8[%c0_21, %c0_22] : memref<12x16xf32, #tpu.memory_space<vmem>>, vector<12x16xf32>
    %27 = tpu.iota {dimensions = array<i32: 1>} : vector<8x12xi32>
    %28 = arith.mulf %21, %21 : vector<8x16xf32>
    %cst_23 = arith.constant dense<0.000000e+00> : vector<8xf32>
    %29 = vector.multi_reduction <add>, %28, %cst_23 [1] : vector<8x16xf32> to vector<8xf32>
    %30 = vector.shape_cast %29 : vector<8xf32> to vector<8x1xf32>
    %31 = arith.mulf %25, %25 : vector<12x16xf32>
    %cst_24 = arith.constant dense<0.000000e+00> : vector<12xf32>
    %32 = vector.multi_reduction <add>, %31, %cst_24 [1] : vector<12x16xf32> to vector<12xf32>
    %33 = vector.shape_cast %32 : vector<12xf32> to vector<1x12xf32>
    %cst_25 = arith.constant dense<0.000000e+00> : vector<8x12xf32>
    %34 = tpu.matmul %21, %25, %cst_25 {dimension_numbers = #tpu.dot_dimension_numbers<[1], [1], [0], [0], [0, 0, 1, 0], [], []>} : vector<8x16xf32>, vector<12x16xf32>, vector<8x12xf32> -> vector<8x12xf32>
    %35 = vector.broadcast %30 : vector<8x1xf32> to vector<8x12xf32>
    %36 = vector.broadcast %33 : vector<1x12xf32> to vector<8x12xf32>
    %37 = arith.addf %35, %36 : vector<8x12xf32>
    %cst_26 = arith.constant 2.000000e+00 : f32
    %38 = vector.broadcast %cst_26 : f32 to vector<8x12xf32>
    %39 = arith.mulf %38, %34 : vector<8x12xf32>
    %40 = arith.subf %37, %39 : vector<8x12xf32>
    %cst_27 = arith.constant dense<0x7F800000> : vector<8xf32>
    %41 = vector.multi_reduction <minimumf>, %40, %cst_27 [1] : vector<8x12xf32> to vector<8xf32>
    %42 = vector.shape_cast %41 : vector<8xf32> to vector<8x1xf32>
    %43 = vector.broadcast %42 : vector<8x1xf32> to vector<8x12xf32>
    %44 = arith.cmpf oeq, %40, %43 : vector<8x12xf32>
    %c12_i32 = arith.constant 12 : i32
    %45 = vector.broadcast %c12_i32 : i32 to vector<8x12xi32>
    %46 = arith.select %44, %27, %45 : vector<8x12xi1>, vector<8x12xi32>
    %cst_28 = arith.constant dense<2147483647> : vector<8xi32>
    %47 = vector.multi_reduction <minsi>, %46, %cst_28 [1] : vector<8x12xi32> to vector<8xi32>
    %48 = vector.shape_cast %47 : vector<8xi32> to vector<8x1xi32>
    %c0_i32_29 = arith.constant 0 : i32
    %49 = vector.broadcast %c0_i32_29 : i32 to vector<8x3xi32>
    %50 = arith.cmpi eq, %23, %49 : vector<8x3xi32>
    %51 = vector.shape_cast %48 : vector<8x1xi32> to vector<8x1xi32>
    %52 = vector.broadcast %51 : vector<8x1xi32> to vector<8x3xi32>
    %53 = arith.select %50, %52, %24 : vector<8x3xi1>, vector<8x3xi32>
    %54 = vector.broadcast %48 : vector<8x1xi32> to vector<8x12xi32>
    %55 = arith.cmpi eq, %27, %54 : vector<8x12xi32>
    %56 = arith.extui %55 : vector<8x12xi1> to vector<8x12xi32>
    %57 = arith.sitofp %56 : vector<8x12xi32> to vector<8x12xf32>
    %cst_30 = arith.constant dense<0.000000e+00> : vector<8x16xf32>
    %58 = tpu.matmul %57, %26, %cst_30 {dimension_numbers = #tpu.dot_dimension_numbers<[1], [0], [0], [1], [0, 0, 1, 1], [], []>} : vector<8x12xf32>, vector<12x16xf32>, vector<8x16xf32> -> vector<8x16xf32>
    %59 = arith.subf %21, %58 : vector<8x16xf32>
    %60 = arith.addf %22, %58 : vector<8x16xf32>
    %c0_31 = arith.constant 0 : index
    %c0_32 = arith.constant 0 : index
    %61 = vector.load %arg9[%c0_31, %c0_32] : memref<12x16xf32, #tpu.memory_space<vmem>>, vector<12x16xf32>
    %c0_33 = arith.constant 0 : index
    %c0_34 = arith.constant 0 : index
    %62 = vector.load %arg10[%c0_33, %c0_34] : memref<12x16xf32, #tpu.memory_space<vmem>>, vector<12x16xf32>
    %63 = arith.mulf %59, %59 : vector<8x16xf32>
    %cst_35 = arith.constant dense<0.000000e+00> : vector<8xf32>
    %64 = vector.multi_reduction <add>, %63, %cst_35 [1] : vector<8x16xf32> to vector<8xf32>
    %65 = vector.shape_cast %64 : vector<8xf32> to vector<8x1xf32>
    %66 = arith.mulf %61, %61 : vector<12x16xf32>
    %cst_36 = arith.constant dense<0.000000e+00> : vector<12xf32>
    %67 = vector.multi_reduction <add>, %66, %cst_36 [1] : vector<12x16xf32> to vector<12xf32>
    %68 = vector.shape_cast %67 : vector<12xf32> to vector<1x12xf32>
    %cst_37 = arith.constant dense<0.000000e+00> : vector<8x12xf32>
    %69 = tpu.matmul %59, %61, %cst_37 {dimension_numbers = #tpu.dot_dimension_numbers<[1], [1], [0], [0], [0, 0, 1, 0], [], []>} : vector<8x16xf32>, vector<12x16xf32>, vector<8x12xf32> -> vector<8x12xf32>
    %70 = vector.broadcast %65 : vector<8x1xf32> to vector<8x12xf32>
    %71 = vector.broadcast %68 : vector<1x12xf32> to vector<8x12xf32>
    %72 = arith.addf %70, %71 : vector<8x12xf32>
    %cst_38 = arith.constant 2.000000e+00 : f32
    %73 = vector.broadcast %cst_38 : f32 to vector<8x12xf32>
    %74 = arith.mulf %73, %69 : vector<8x12xf32>
    %75 = arith.subf %72, %74 : vector<8x12xf32>
    %cst_39 = arith.constant dense<0x7F800000> : vector<8xf32>
    %76 = vector.multi_reduction <minimumf>, %75, %cst_39 [1] : vector<8x12xf32> to vector<8xf32>
    %77 = vector.shape_cast %76 : vector<8xf32> to vector<8x1xf32>
    %78 = vector.broadcast %77 : vector<8x1xf32> to vector<8x12xf32>
    %79 = arith.cmpf oeq, %75, %78 : vector<8x12xf32>
    %c12_i32_40 = arith.constant 12 : i32
    %80 = vector.broadcast %c12_i32_40 : i32 to vector<8x12xi32>
    %81 = arith.select %79, %27, %80 : vector<8x12xi1>, vector<8x12xi32>
    %cst_41 = arith.constant dense<2147483647> : vector<8xi32>
    %82 = vector.multi_reduction <minsi>, %81, %cst_41 [1] : vector<8x12xi32> to vector<8xi32>
    %83 = vector.shape_cast %82 : vector<8xi32> to vector<8x1xi32>
    %c1_i32 = arith.constant 1 : i32
    %84 = vector.broadcast %c1_i32 : i32 to vector<8x3xi32>
    %85 = arith.cmpi eq, %23, %84 : vector<8x3xi32>
    %86 = vector.shape_cast %83 : vector<8x1xi32> to vector<8x1xi32>
    %87 = vector.broadcast %86 : vector<8x1xi32> to vector<8x3xi32>
    %88 = arith.select %85, %87, %53 : vector<8x3xi1>, vector<8x3xi32>
    %89 = vector.broadcast %83 : vector<8x1xi32> to vector<8x12xi32>
    %90 = arith.cmpi eq, %27, %89 : vector<8x12xi32>
    %91 = arith.extui %90 : vector<8x12xi1> to vector<8x12xi32>
    %92 = arith.sitofp %91 : vector<8x12xi32> to vector<8x12xf32>
    %cst_42 = arith.constant dense<0.000000e+00> : vector<8x16xf32>
    %93 = tpu.matmul %92, %62, %cst_42 {dimension_numbers = #tpu.dot_dimension_numbers<[1], [0], [0], [1], [0, 0, 1, 1], [], []>} : vector<8x12xf32>, vector<12x16xf32>, vector<8x16xf32> -> vector<8x16xf32>
    %94 = arith.subf %59, %93 : vector<8x16xf32>
    %95 = arith.addf %60, %93 : vector<8x16xf32>
    %c0_43 = arith.constant 0 : index
    %c0_44 = arith.constant 0 : index
    %96 = vector.load %arg11[%c0_43, %c0_44] : memref<12x16xf32, #tpu.memory_space<vmem>>, vector<12x16xf32>
    %c0_45 = arith.constant 0 : index
    %c0_46 = arith.constant 0 : index
    %97 = vector.load %arg12[%c0_45, %c0_46] : memref<12x16xf32, #tpu.memory_space<vmem>>, vector<12x16xf32>
    %98 = arith.mulf %94, %94 : vector<8x16xf32>
    %cst_47 = arith.constant dense<0.000000e+00> : vector<8xf32>
    %99 = vector.multi_reduction <add>, %98, %cst_47 [1] : vector<8x16xf32> to vector<8xf32>
    %100 = vector.shape_cast %99 : vector<8xf32> to vector<8x1xf32>
    %101 = arith.mulf %96, %96 : vector<12x16xf32>
    %cst_48 = arith.constant dense<0.000000e+00> : vector<12xf32>
    %102 = vector.multi_reduction <add>, %101, %cst_48 [1] : vector<12x16xf32> to vector<12xf32>
    %103 = vector.shape_cast %102 : vector<12xf32> to vector<1x12xf32>
    %cst_49 = arith.constant dense<0.000000e+00> : vector<8x12xf32>
    %104 = tpu.matmul %94, %96, %cst_49 {dimension_numbers = #tpu.dot_dimension_numbers<[1], [1], [0], [0], [0, 0, 1, 0], [], []>} : vector<8x16xf32>, vector<12x16xf32>, vector<8x12xf32> -> vector<8x12xf32>
    %105 = vector.broadcast %100 : vector<8x1xf32> to vector<8x12xf32>
    %106 = vector.broadcast %103 : vector<1x12xf32> to vector<8x12xf32>
    %107 = arith.addf %105, %106 : vector<8x12xf32>
    %cst_50 = arith.constant 2.000000e+00 : f32
    %108 = vector.broadcast %cst_50 : f32 to vector<8x12xf32>
    %109 = arith.mulf %108, %104 : vector<8x12xf32>
    %110 = arith.subf %107, %109 : vector<8x12xf32>
    %cst_51 = arith.constant dense<0x7F800000> : vector<8xf32>
    %111 = vector.multi_reduction <minimumf>, %110, %cst_51 [1] : vector<8x12xf32> to vector<8xf32>
    %112 = vector.shape_cast %111 : vector<8xf32> to vector<8x1xf32>
    %113 = vector.broadcast %112 : vector<8x1xf32> to vector<8x12xf32>
    %114 = arith.cmpf oeq, %110, %113 : vector<8x12xf32>
    %c12_i32_52 = arith.constant 12 : i32
    %115 = vector.broadcast %c12_i32_52 : i32 to vector<8x12xi32>
    %116 = arith.select %114, %27, %115 : vector<8x12xi1>, vector<8x12xi32>
    %cst_53 = arith.constant dense<2147483647> : vector<8xi32>
    %117 = vector.multi_reduction <minsi>, %116, %cst_53 [1] : vector<8x12xi32> to vector<8xi32>
    %118 = vector.shape_cast %117 : vector<8xi32> to vector<8x1xi32>
    %c2_i32 = arith.constant 2 : i32
    %119 = vector.broadcast %c2_i32 : i32 to vector<8x3xi32>
    %120 = arith.cmpi eq, %23, %119 : vector<8x3xi32>
    %121 = vector.shape_cast %118 : vector<8x1xi32> to vector<8x1xi32>
    %122 = vector.broadcast %121 : vector<8x1xi32> to vector<8x3xi32>
    %123 = arith.select %120, %122, %88 : vector<8x3xi1>, vector<8x3xi32>
    %124 = vector.broadcast %118 : vector<8x1xi32> to vector<8x12xi32>
    %125 = arith.cmpi eq, %27, %124 : vector<8x12xi32>
    %126 = arith.extui %125 : vector<8x12xi1> to vector<8x12xi32>
    %127 = arith.sitofp %126 : vector<8x12xi32> to vector<8x12xf32>
    %cst_54 = arith.constant dense<0.000000e+00> : vector<8x16xf32>
    %128 = tpu.matmul %127, %97, %cst_54 {dimension_numbers = #tpu.dot_dimension_numbers<[1], [0], [0], [1], [0, 0, 1, 1], [], []>} : vector<8x12xf32>, vector<12x16xf32>, vector<8x16xf32> -> vector<8x16xf32>
    %129 = arith.subf %94, %128 : vector<8x16xf32>
    %130 = arith.addf %95, %128 : vector<8x16xf32>
    %c0_55 = arith.constant 0 : index
    %c0_56 = arith.constant 0 : index
    %131 = vector.load %arg20[%c0_55, %c0_56] : memref<8x3xi32, #tpu.memory_space<vmem>>, vector<8x3xi32>
    tpu.vector_store %arg20[%c0_55, %c0_56], %123 {strides = array<i32>} : memref<8x3xi32, #tpu.memory_space<vmem>>, vector<8x3xi32>,
    %132 = arith.subf %129, %130 : vector<8x16xf32>
    %133 = arith.mulf %132, %132 : vector<8x16xf32>
    %134 = vector.shape_cast %133 : vector<8x16xf32> to vector<1x8x16xf32>
    %cst_57 = arith.constant dense<0.000000e+00> : vector<1xf32>
    %135 = vector.multi_reduction <add>, %134, %cst_57 [1, 2] : vector<1x8x16xf32> to vector<1xf32>
    %136 = vector.shape_cast %135 : vector<1xf32> to vector<1x1x1xf32>
    %137 = vector.extract %136[0, 0, 0] : f32 from vector<1x1x1xf32>
    %cst_58 = arith.constant 1.280000e+02 : f32
    %138 = arith.divf %137, %cst_58 : f32
    %cst_59 = arith.constant 3.000000e+00 : f32
    %cst_60 = arith.constant 1.250000e+00 : f32
    %139 = arith.mulf %cst_59, %cst_60 : f32
    %140 = arith.mulf %139, %138 : f32
    %c0_61 = arith.constant 0 : index
    %c0_62 = arith.constant 0 : index
    %141 = memref.load %arg22[%c0_61, %c0_62] : memref<1x1xf32, #tpu.memory_space<smem>>
    memref.store %140, %arg22[%c0_61, %c0_62] : memref<1x1xf32, #tpu.memory_space<smem>>
    %c0_63 = arith.constant 0 : index
    %c0_64 = arith.constant 0 : index
    %142 = vector.load %arg13[%c0_63, %c0_64] : memref<16x32xf32, #tpu.memory_space<vmem>>, vector<16x32xf32>
    %cst_65 = arith.constant dense<0.000000e+00> : vector<8x32xf32>
    %143 = tpu.matmul %130, %142, %cst_65 {dimension_numbers = #tpu.dot_dimension_numbers<[1], [0], [0], [1], [0, 0, 1, 1], [], []>} : vector<8x16xf32>, vector<16x32xf32>, vector<8x32xf32> -> vector<8x32xf32>
    %c0_66 = arith.constant 0 : index
    %c0_67 = arith.constant 0 : index
    %144 = vector.load %arg14[%c0_66, %c0_67] : memref<1x32xf32, #tpu.memory_space<vmem>>, vector<1x32xf32>
    %145 = vector.broadcast %144 : vector<1x32xf32> to vector<8x32xf32>
    %146 = arith.addf %143, %145 : vector<8x32xf32>
    %cst_68 = arith.constant 0.000000e+00 : f32
    %147 = vector.broadcast %cst_68 : f32 to vector<8x32xf32>
    %148 = arith.maximumf %146, %147 : vector<8x32xf32>
    %c0_69 = arith.constant 0 : index
    %c0_70 = arith.constant 0 : index
    %149 = vector.load %arg15[%c0_69, %c0_70] : memref<32x48xf32, #tpu.memory_space<vmem>>, vector<32x48xf32>
    %cst_71 = arith.constant dense<0.000000e+00> : vector<8x48xf32>
    %150 = tpu.matmul %148, %149, %cst_71 {dimension_numbers = #tpu.dot_dimension_numbers<[1], [0], [0], [1], [0, 0, 1, 1], [], []>} : vector<8x32xf32>, vector<32x48xf32>, vector<8x48xf32> -> vector<8x48xf32>
    %c0_72 = arith.constant 0 : index
    %c0_73 = arith.constant 0 : index
    %151 = vector.load %arg16[%c0_72, %c0_73] : memref<1x48xf32, #tpu.memory_space<vmem>>, vector<1x48xf32>
    %152 = vector.broadcast %151 : vector<1x48xf32> to vector<8x48xf32>
    %153 = arith.addf %150, %152 : vector<8x48xf32>
    %cst_74 = arith.constant 0.000000e+00 : f32
    %154 = vector.broadcast %cst_74 : f32 to vector<8x48xf32>
    %155 = arith.maximumf %153, %154 : vector<8x48xf32>
    %c0_75 = arith.constant 0 : index
    %c0_76 = arith.constant 0 : index
    %156 = vector.load %arg17[%c0_75, %c0_76] : memref<48x64xf32, #tpu.memory_space<vmem>>, vector<48x64xf32>
    %cst_77 = arith.constant dense<0.000000e+00> : vector<8x64xf32>
    %157 = tpu.matmul %155, %156, %cst_77 {dimension_numbers = #tpu.dot_dimension_numbers<[1], [0], [0], [1], [0, 0, 1, 1], [], []>} : vector<8x48xf32>, vector<48x64xf32>, vector<8x64xf32> -> vector<8x64xf32>
    %c0_78 = arith.constant 0 : index
    %c0_79 = arith.constant 0 : index
    %158 = vector.load %arg18[%c0_78, %c0_79] : memref<1x64xf32, #tpu.memory_space<vmem>>, vector<1x64xf32>
    %159 = vector.broadcast %158 : vector<1x64xf32> to vector<8x64xf32>
    %160 = arith.addf %157, %159 : vector<8x64xf32>
    %cst_80 = arith.constant 0.000000e+00 : f32
    %161 = vector.broadcast %cst_80 : f32 to vector<8x64xf32>
    %162 = arith.maximumf %160, %161 : vector<8x64xf32>
    %c0_81 = arith.constant 0 : index
    %c0_82 = arith.constant 0 : index
    %163 = vector.load %arg19[%c0_81, %c0_82] : memref<8x64xf32, #tpu.memory_space<vmem>>, vector<8x64xf32>
    tpu.vector_store %arg19[%c0_81, %c0_82], %162 {strides = array<i32>} : memref<8x64xf32, #tpu.memory_space<vmem>>, vector<8x64xf32>,
    %164 = arith.subf %162, %0 : vector<8x64xf32>
    %165 = arith.mulf %164, %164 : vector<8x64xf32>
    %166 = vector.shape_cast %165 : vector<8x64xf32> to vector<1x8x64xf32>
    %cst_83 = arith.constant dense<0.000000e+00> : vector<1xf32>
    %167 = vector.multi_reduction <add>, %166, %cst_83 [1, 2] : vector<1x8x64xf32> to vector<1xf32>
    %168 = vector.shape_cast %167 : vector<1xf32> to vector<1x1x1xf32>
    %169 = vector.extract %168[0, 0, 0] : f32 from vector<1x1x1xf32>
    %cst_84 = arith.constant 5.120000e+02 : f32
    %170 = arith.divf %169, %cst_84 : f32
    %c0_85 = arith.constant 0 : index
    %c0_86 = arith.constant 0 : index
    %171 = memref.load %arg21[%c0_85, %c0_86] : memref<1x1xf32, #tpu.memory_space<smem>>
    memref.store %170, %arg21[%c0_85, %c0_86] : memref<1x1xf32, #tpu.memory_space<smem>>
    return
  }
}

</mosaic_0001>

<bundles_post_ra>
// kernel: rqvae_forward.1
= control target key start
LH: loop header
LB: loop body
LE: loop exit
PB: predicated region body
PF: predicated region fallthrough
CT: control target
= control target key end

     0   :  { %s2288_s0 = inlined_call_operand.vmem [shape: f32[8,64], index: 0, kind: input, shape index: {}]   ;;  %s2289_s1 = inlined_call_operand.vmem [shape: f32[64,48], index: 1, kind: input, shape index: {}]   ;;  %s2290_s2 = inlined_call_operand.hbm [shape: f32[1,48], index: 2, kind: input, shape index: {}]   ;;  %s2291_s3 = inlined_call_operand.vmem [shape: f32[48,32], index: 3, kind: input, shape index: {}]   ;;  %s2292_s4 = inlined_call_operand.hbm [shape: f32[1,32], index: 4, kind: input, shape index: {}]   ;;  %s2293_s5 = inlined_call_operand.vmem [shape: f32[32,16], index: 5, kind: input, shape index: {}]   ;;  %s2294_s6 = inlined_call_operand.hbm [shape: f32[1,16], index: 6, kind: input, shape index: {}]   ;;  %s2295_s7 = inlined_call_operand.vmem [shape: f32[12,16], index: 7, kind: input, shape index: {}]   ;;  %s2296_s8 = inlined_call_operand.vmem [shape: f32[12,16], index: 8, kind: input, shape index: {}]   ;;  %s2297_s9 = inlined_call_operand.vmem [shape: f32[12,16], index: 9, kind: input, shape index: {}]   ;;  %s2298_s10 = inlined_call_operand.vmem [shape: f32[12,16], index: 10, kind: input, shape index: {}]   ;;  %s2299_s11 = inlined_call_operand.vmem [shape: f32[12,16], index: 11, kind: input, shape index: {}]   ;;  %s2300_s12 = inlined_call_operand.vmem [shape: f32[12,16], index: 12, kind: input, shape index: {}]   ;;  %s2301_s13 = inlined_call_operand.hbm [shape: f32[16,32], index: 13, kind: input, shape index: {}]   ;;  %s2302_s14 = inlined_call_operand.hbm [shape: f32[1,32], index: 14, kind: input, shape index: {}]   ;;  %s2303_s15 = inlined_call_operand.vmem [shape: f32[32,48], index: 15, kind: input, shape index: {}]   ;;  %s2304_s16 = inlined_call_operand.hbm [shape: f32[1,48], index: 16, kind: input, shape index: {}]   ;;  %s2305_s17 = inlined_call_operand.vmem [shape: f32[48,64], index: 17, kind: input, shape index: {}]   ;;  %s2306_s18 = inlined_call_operand.hbm [shape: f32[1,64], index: 18, kind: input, shape index: {}]   ;;  %s2307_s19 = inlined_call_operand.hbm [shape: f32[8,64], index: 19, kind: output, shape index: {0}]   ;;  %s2308_s20 = inlined_call_operand.vmem [shape: s32[8,3], index: 20, kind: output, shape index: {1}]   ;;  %s2309_s21 = inlined_call_operand.hbm [shape: f32[1,1], index: 21, kind: output, shape index: {2}]   ;;  %s2310_s22 = inlined_call_operand.hbm [shape: f32[1,1], index: 22, kind: output, shape index: {3}]  }
   0x1   :  { %2314 = sst [smem:[#allocation26_spill]] %s2288_s0 }
   0x2   :  { %2315 = sst [smem:[#allocation27_spill]] %s2289_s1 }
   0x3   :  { %2316 = sst [smem:[#allocation28_spill]] %s2290_s2 }
   0x4   :  { %2317 = sst [smem:[#allocation29_spill]] %s2291_s3 }
   0x5   :  { %2318 = sst [smem:[#allocation30_spill]] %s2292_s4 }
   0x6   :  { %2319 = sst [smem:[#allocation31_spill]] %s2293_s5 }
   0x7   :  { %2320 = sst [smem:[#allocation32_spill]] %s2294_s6 }
   0x8   :  { %28 = vsyncpa [#allocation3], 0 }
   0x9   :  { %29 = vsyncpa [#allocation7], 0 }
   0xa   :  { %30 = vsyncpa [#allocation10], 0 }
   0xb   :  { %31 = vsyncpa [#allocation13], 0 }
   0xc   :  { %32 = vsyncpa [#allocation4], 0 }
   0xd   :  { %33 = vsyncpa [#allocation5], 0 }
   0xe   :  { %34 = vsyncpa [#allocation18], 0  ;;  %s1840_s3 = smov [#allocation6]   ;;  %s1841_s29 = smov [#allocation9]  }
   0xf   :  { %s57_s28 = sshll.u32 %s1840_s3, 4  ;;  %s90_s30 = sshll.u32 %s1841_s29, 4  ;;  %s58_s28 = int_to_ptr.vmem [resolvable:$true] %s57_s28  ;;  %s91_s30 = int_to_ptr.vmem [resolvable:$true] %s90_s30 }
  0x10   :  { %s1658_s4 = scalar_lea.vmem %s58_s28, 16  ;;  %s1662_s0 = scalar_lea.vmem %s58_s28, 32 }
  0x11   :  { %p1659_p0 = scmp.ne.s32.totalorder %s58_s28, %s1658_s4  ;;  %p1663_p1 = scmp.lt.s32.totalorder %s58_s28, %s58_s28 }
  0x12   :  { %p1664_p2 = scmp.lt.s32.totalorder %s1662_s0, %s1658_s4 }
  0x14   :  { %p1665_p3 = por %p1664_p2, %p1663_p1 }
  0x16   :  { %p1666_p4 = pnand %p1665_p3, %p1659_p0 }
  0x18   :  { %1669 = shalt.err (!%p1666_p4)
}
  0x19   :  { %s2321_s5 = sld [smem:[#allocation30_spill]]  ;;  %s1678_s24 = scalar_lea.vmem %s91_s30, 256 }
  0x1a   :  { %p1679_p5 = scmp.ne.s32.totalorder %s91_s30, %s1678_s24  ;;  %p1683_p6 = scmp.lt.s32.totalorder %s91_s30, %s91_s30 }
  0x1b   :  { %p1684_p7 = scmp.lt.s32.totalorder %s1678_s24, %s1678_s24 }
  0x1d   :  { %p1685_p8 = por %p1684_p7, %p1683_p6 }
  0x1f   :  { %60 = dma.hbm_to_vmem [thread:$0]  %s2321_s5, 16, %s58_s28, [#allocation7]  }
  0x20   :  { %p1686_p9 = pnand %p1685_p8, %p1679_p5 }
  0x22   :  { %1689 = shalt.err (!%p1686_p9)
}
  0x23   :  { %s1842_s6 = smov 128   ;;  %s1843_s25 = smov 8  }
  0x24   :  { %96 = dma.hbm_to_vmem [thread:$0]  %s2301_s13, 256, %s91_s30, [#allocation10], %s1842_s6, %s1842_s6, %s1843_s25  }
  0x25   :  { %s1844_s27 = smov [#allocation12]   ;;  %s1845_s29 = smov [#allocation2]  }
  0x26   :  { %s115_s3 = sshll.u32 %s1844_s27, 4  ;;  %s45_s4 = sshll.u32 %s1845_s29, 4  ;;  %s116_s3 = int_to_ptr.vmem [resolvable:$true] %s115_s3  ;;  %s46_s4 = int_to_ptr.vmem [resolvable:$true] %s45_s4 }
  0x27   :  { %s1698_s28 = scalar_lea.vmem %s116_s3, 16  ;;  %s1702_s0 = scalar_lea.vmem %s116_s3, 32 }
  0x28   :  { %p1699_p10 = scmp.ne.s32.totalorder %s116_s3, %s1698_s28  ;;  %p1703_p11 = scmp.lt.s32.totalorder %s116_s3, %s116_s3 }
  0x29   :  { %p1704_p12 = scmp.lt.s32.totalorder %s1702_s0, %s1698_s28 }
  0x2b   :  { %p1705_p13 = por %p1704_p12, %p1703_p11 }
  0x2d   :  { %p1706_p0 = pnand %p1705_p13, %p1699_p10 }
  0x2f   :  { %1709 = shalt.err (!%p1706_p0)
}
  0x30   :  { %118 = dma.hbm_to_vmem [thread:$0]  %s2304_s16, 16, %s116_s3, [#allocation13]  }
  0x31   :  { %s1718_s5 = scalar_lea.vmem %s46_s4, 16  ;;  %s1722_s13 = scalar_lea.vmem %s46_s4, 32 }
  0x32   :  { %p1719_p1 = scmp.ne.s32.totalorder %s46_s4, %s1718_s5  ;;  %p1723_p2 = scmp.lt.s32.totalorder %s46_s4, %s46_s4 }
  0x33   :  { %p1724_p3 = scmp.lt.s32.totalorder %s1722_s13, %s1718_s5 }
  0x35   :  { %p1725_p4 = por %p1724_p3, %p1723_p2 }
  0x37   :  { %p1726_p5 = pnand %p1725_p4, %p1719_p1 }
  0x39   :  { %1729 = shalt.err (!%p1726_p5)
}
  0x3a   :  { %s2322_s6 = sld [smem:[#allocation28_spill]]  ;;  %s1846_s25 = smov [#allocation8]  }
  0x3b   :  { %s69_s26 = sshll.u32 %s1846_s25, 4  ;;  %s1847_s2 = smov [#allocation11]   ;;  %s70_s26 = int_to_ptr.vmem [resolvable:$true] %s69_s26 }
  0x3c   :  { %s103_s27 = sshll.u32 %s1847_s2, 4  ;;  %s1738_s29 = scalar_lea.vmem %s70_s26, 16  ;;  %s104_s27 = int_to_ptr.vmem [resolvable:$true] %s103_s27 }
  0x3d   :  { %p1739_p6 = scmp.ne.s32.totalorder %s70_s26, %s1738_s29  ;;  %s1742_s16 = scalar_lea.vmem %s70_s26, 32 }
  0x3e   :  { %p1743_p7 = scmp.lt.s32.totalorder %s70_s26, %s70_s26  ;;  %p1744_p8 = scmp.lt.s32.totalorder %s1742_s16, %s1738_s29 }
  0x40   :  { %48 = dma.hbm_to_vmem [thread:$0]  %s2322_s6, 16, %s46_s4, [#allocation3]  }
  0x41   :  { %p1745_p9 = por %p1744_p8, %p1743_p7 }
  0x43   :  { %p1746_p10 = pnand %p1745_p9, %p1739_p6 }
  0x45   :  { %1749 = shalt.err (!%p1746_p10)
}
  0x46   :  { %s2323_s0 = sld [smem:[#allocation32_spill]]  ;;  %s1758_s23 = scalar_lea.vmem %s104_s27, 16 }
  0x47   :  { %p1759_p11 = scmp.ne.s32.totalorder %s104_s27, %s1758_s23  ;;  %s1762_s4 = scalar_lea.vmem %s104_s27, 32 }
  0x48   :  { %p1763_p12 = scmp.lt.s32.totalorder %s104_s27, %s104_s27  ;;  %p1764_p13 = scmp.lt.s32.totalorder %s1762_s4, %s1758_s23 }
  0x4a   :  { %p1765_p0 = por %p1764_p13, %p1763_p12 }
  0x4c   :  { %72 = dma.hbm_to_vmem [thread:$0]  %s2323_s0, 16, %s70_s26, [#allocation7]  }
  0x4d   :  { %p1766_p1 = pnand %p1765_p0, %p1759_p11 }
  0x4f   :  { %1769 = shalt.err (!%p1766_p1)
}
  0x50   :  { %106 = dma.hbm_to_vmem [thread:$0]  %s2302_s14, 16, %s104_s27, [#allocation10]  }
  0x51   :  { %s1848_s13 = smov [#allocation14]  }
  0x52   :  { %s127_s30 = sshll.u32 %s1848_s13, 4  ;;  %s128_s30 = int_to_ptr.vmem [resolvable:$true] %s127_s30 }
  0x53   :  { %s1778_s24 = scalar_lea.vmem %s128_s30, 16  ;;  %s1782_s6 = scalar_lea.vmem %s128_s30, 32 }
  0x54   :  { %p1779_p2 = scmp.ne.s32.totalorder %s128_s30, %s1778_s24  ;;  %p1783_p3 = scmp.lt.s32.totalorder %s128_s30, %s128_s30 }
  0x55   :  { %p1784_p4 = scmp.lt.s32.totalorder %s1782_s6, %s1778_s24 }
  0x57   :  { %p1785_p5 = por %p1784_p4, %p1783_p3 }
  0x59   :  { %p1786_p6 = pnand %p1785_p5, %p1779_p2 }
  0x5b   :  { %1789 = shalt.err (!%p1786_p6)
}
  0x5c   :  { %130 = dma.hbm_to_vmem [thread:$0]  %s2306_s18, 16, %s128_s30, [#allocation13]  }
  0x5d   :  { %1826 = dma.done.wait [#allocation3], 16  }
  0x5e   :  { %1827 = vsyncadd [#allocation3], 4294967280 }
  0x5f   :  { %1828 = dma.done.wait [#allocation7], 32  }
  0x60   :  { %1829 = vsyncadd [#allocation7], 4294967264 }
  0x61   :  { %1830 = dma.done.wait [#allocation10], 272  }
  0x62   :  { %1831 = vsyncadd [#allocation10], 4294967024 }
  0x63   :  { %1832 = dma.done.wait [#allocation13], 32  }
  0x64   :  { %1833 = vsyncadd [#allocation13], 4294967264  ;;  %v1849_v0 = vmov 0.0   ;;  %vm1850_vm0 = vmmov 0   ;;  %s2324_s2 = sld [smem:[#allocation27_spill]]  ;;  %vm168_vm1 = vcmask 523264   ;;  %v417_v43 = vlaneseq }
  0x65   :  { %1512 = vmatprep.subr.mxu0 %v1849_v0  ;;  %1528 = vmatprep.mubr.msk.f32.mxu0 %vm1850_vm0, %v1849_v0  ;;  %s2325_s23 = sld [smem:[#allocation29_spill]]  ;;  %v1428_v16 = vld [vmem:[#allocation2] ss:$0 sm:$0xff]  ;;  %vm256_vm2 = vcmask 392192   ;;  %v420_v25 = vld [vmem:[%s2295_s7 + $0x8] sm:$0xf] }
  0x66   :  { %1531 = vmatprep.subr.mxu1 %v1849_v0  ;;  %1543 = vmatprep.mubr.msk.f32.mxu1 %vm1850_vm0, %v1849_v0  ;;  %s2326_s0 = sld [smem:[#allocation26_spill]]  ;;  %vm424_vm3 = vcmask 130048   ;;  %v1430_v26 = vld [vmem:[#allocation6] ss:$0 sm:$0xff]  ;;  %vm342_vm4 = vcmask 261120   ;;  %v429_v34 = vmul.f32 %v420_v25, %v420_v25  ;;  %vm433_vm5 = vcmask 125952  }
  0x67   :  { %s2327_s25 = sld [smem:[#allocation31_spill]]  ;;  %v419_v31 = vld [vmem:[%s2295_s7] sm:$0xff]  ;;  %v2104_v44 = vand.u32 127, %v417_v43  ;;  %v519_v46 = vshrl.u32 %v417_v43, 7  ;;  %vm527_vm6 = vcmask 130112   ;;  %vm545_vm7 = vcmask 97280  }
  0x68   :  { %v428_v32 = vmul.f32 %v419_v31, %v419_v31  ;;  %v434_v35 = vsel %vm433_vm5, %v429_v34, 0.0  ;;  %v1432_v36 = vld [vmem:[#allocation8] ss:$0 sm:$0xff]  ;;  %vm574_vm10 = vcmask 1043456  }
  0x69   :  { %v522_v47 = vadd.s32 4294967288, %v2104_v44  ;;  %v2108_v48 = vsub.s32 %v2104_v44, %v519_v46  ;;  %vm566_vm14 = vcmp.eq.s32.totalorder %v2104_v44, 0  ;;  %vm786_vm15 = vcmp.eq.s32.totalorder %v2104_v44, 1 }
  0x6a   :  { %v160_v1 = vld [vmem:[%s2324_s2 + $0x38] sm:$0xff]  ;;  %v159_v2 = vld [vmem:[%s2324_s2 + $0x30] sm:$0xff]  ;;  %v158_v3 = vld [vmem:[%s2324_s2 + $0x28] sm:$0xff]  ;;  %v430_v33 = vsel %vm424_vm3, %v428_v32, 0.0 }
  0x6b   :  { %1513 = vmatpush3.msra.mxu0 %v160_v1  ;;  %v248_v4 = vld [vmem:[%s2325_s23 + $0x28] sm:$0xff]  ;;  %v247_v5 = vld [vmem:[%s2325_s23 + $0x20] sm:$0xff]  ;;  %v246_v7 = vld [vmem:[%s2325_s23 + $0x18] sm:$0xff]  ;;  %431 = vadd.xlane.f32.xlu0 %v430_v33  ;;  %v2110_v49 = vsub.s32 %v522_v47, %v519_v46 }
  0x6c   :  { %1514 = vmatprep.subr.mxu0 %v1849_v0  ;;  %v157_v6 = vld [vmem:[%s2324_s2 + $0x20] sm:$0xff]  ;;  %1532 = vmatpush3.msra.mxu1 %v248_v4  ;;  %v156_v8 = vld [vmem:[%s2324_s2 + $0x18] sm:$0xff]  ;;  %v155_v9 = vld [vmem:[%s2324_s2 + $0x10] sm:$0xff] }
  0x6d   :  { %1515 = vmatpush3.msra.mxu0 %v159_v2  ;;  %1533 = vmatprep.subr.mxu1 %v1849_v0  ;;  %v154_v10 = vld [vmem:[%s2324_s2 + $0x8] sm:$0xff]  ;;  %v153_v11 = vld [vmem:[%s2324_s2] sm:$0xff]  ;;  %v245_v13 = vld [vmem:[%s2325_s23 + $0x10] sm:$0xff] }
  0x6e   :  { %1516 = vmatprep.subr.mxu0 %v1849_v0  ;;  %1534 = vmatpush3.msra.mxu1 %v247_v5  ;;  %v2041_v12 = vld [vmem:[%s2326_s0] sm:$0xff]  ;;  %v244_v14 = vld [vmem:[%s2325_s23 + $0x8] sm:$0xff]  ;;  %v334_v21 = vld [vmem:[%s2327_s25 + $0x18] sm:$0xff] }
  0x6f   :  { %1517 = vmatpush3.msra.mxu0 %v158_v3  ;;  %1535 = vmatprep.subr.mxu1 %v1849_v0  ;;  %v243_v15 = vld [vmem:[%s2325_s23] sm:$0xff]  ;;  %v333_v22 = vld [vmem:[%s2327_s25 + $0x10] sm:$0xff]  ;;  %v332_v23 = vld [vmem:[%s2327_s25 + $0x8] sm:$0xff] }
  0x70   :  { %1518 = vmatprep.subr.mxu0 %v1849_v0  ;;  %1536 = vmatpush3.msra.mxu1 %v246_v7  ;;  %v331_v24 = vld [vmem:[%s2327_s25] sm:$0xff]  ;;  %v422_v7 = vld [vmem:[%s2296_s8 + $0x8] sm:$0xf] }
  0x71   :  { %1519 = vmatpush3.msra.mxu0 %v157_v6  ;;  %1537 = vmatprep.subr.mxu1 %v1849_v0 }
  0x72   :  { %1520 = vmatprep.subr.mxu0 %v1849_v0  ;;  %1538 = vmatpush3.msra.mxu1 %v245_v13 }
  0x73   :  { %1521 = vmatpush3.msra.mxu0 %v156_v8  ;;  %1539 = vmatprep.subr.mxu1 %v1849_v0  ;;  %v421_v8 = vld [vmem:[%s2296_s8] sm:$0xff] }
  0x74   :  { %1522 = vmatprep.subr.mxu0 %v1849_v0  ;;  %1540 = vmatpush3.msra.mxu1 %v244_v14 }
  0x75   :  { %1523 = vmatpush3.msra.mxu0 %v155_v9  ;;  %1541 = vmatprep.subr.mxu1 %v1849_v0  ;;  %v651_v9 = vld [vmem:[%s2297_s9 + $0x8] sm:$0xf] }
  0x76   :  { %1524 = vmatprep.subr.mxu0 %v1849_v0  ;;  %1542 = vmatpush3.msra.mxu1 %v243_v15 }
  0x77   :  { %1525 = vmatpush3.msra.mxu0 %v154_v10  ;;  %1546 = vmatprep.subr.mxu1 %v1849_v0 }
  0x78   :  { %1526 = vmatprep.subr.mxu0 %v1849_v0  ;;  %435 = vadd.xlane.f32.xlu0 %v434_v35 }
  0x79   :  { %1527 = vmatpush3.msra.mxu0 %v153_v11 }
  0x7a   :  { %1529 = vmatmul.mubr.msk.f32.vlgmr.msra.gmra.mxu0 %vm168_vm1, %v2041_v12  ;;  %1557 = vmatprep.subr.mxu0 %v1849_v0 }
  0x7b   :  { %1561 = vmatprep.mubr.msk.f32.mxu0 %vm1850_vm0, %v1849_v0  ;;  %1558 = vmatpush3.xpose.msk.msra.mxu0 %vm424_vm3, %v420_v25 }
  0x7c   :  { %1559 = vmatprep.subr.mxu0 %v1849_v0 }
  0x7f   :  { %1560 = vmatpush3.xpose.msk.msra.mxu0 %vm424_vm3, %v419_v31 }
  0x80   :  { %1571 = vmatprep.subr.mxu0 %v1849_v0 }
  0xf4   :  { %v432_v45 = vpop.xlane.xlu0 %431 }
  0xf5   :  { %v521_v51 = vrot.slane %v432_v45, %v2108_v48 }
 0x101   :  { %v436_v50 = vpop.xlane.xlu0 %435 }
 0x102   :  { %v526_v52 = vrot.slane %v436_v50, %v2110_v49 }
 0x104   :  { %v528_v53 = vsel %vm527_vm6, %v526_v52, %v521_v51  ;;  %v653_v51 = vld [vmem:[%s2298_s10 + $0x8] sm:$0xf]  ;;  %v652_v52 = vld [vmem:[%s2298_s10] sm:$0xff] }
 0x13a   :  { %v238_v17 = vpop.f32.mrf.mxu0 }
 0x13b   :  { %v239_v18 = vadd.f32 %v1428_v16, %v238_v17  ;;  %v650_v17 = vld [vmem:[%s2297_s9] sm:$0xff] }
 0x13c   :  { %v1530_v19 = vpop.f32.mrf.mxu0 }
 0x13d   :  { %v242_v20 = vmax.f32 %v239_v18, 0.0  ;;  %v658_v18 = vmul.f32 %v650_v17, %v650_v17  ;;  %v659_v19 = vmul.f32 %v651_v9, %v651_v9 }
 0x13f   :  { %1544 = vmatmul.mubr.msk.f32.vlgmr.msra.gmra.mxu1 %vm256_vm2, %v242_v20  ;;  %v660_v20 = vsel %vm424_vm3, %v658_v18, 0.0 }
 0x140   :  { %1547 = vmatpush3.msra.mxu1 %v334_v21  ;;  %1554 = vmatprep.mubr.msk.f32.mxu1 %vm1850_vm0, %v1849_v0  ;;  %v663_v21 = vsel %vm433_vm5, %v659_v19, 0.0 }
 0x141   :  { %1548 = vmatprep.subr.mxu1 %v1849_v0 }
 0x142   :  { %1549 = vmatpush3.msra.mxu1 %v333_v22 }
 0x143   :  { %1550 = vmatprep.subr.mxu1 %v1849_v0 }
 0x144   :  { %1551 = vmatpush3.msra.mxu1 %v332_v23 }
 0x145   :  { %1552 = vmatprep.subr.mxu1 %v1849_v0 }
 0x146   :  { %1553 = vmatpush3.msra.mxu1 %v331_v24 }
 0x147   :  { %1564 = vmatprep.subr.mxu1 %v1849_v0 }
 0x1ff   :  { %v326_v27 = vpop.f32.mrf.mxu1 }
 0x200   :  { %v327_v28 = vadd.f32 %v1430_v26, %v326_v27 }
 0x201   :  { %v1545_v29 = vpop.f32.mrf.mxu1 }
 0x202   :  { %v330_v30 = vmax.f32 %v327_v28, 0.0 }
 0x204   :  { %1555 = vmatmul.mubr.msk.f32.vlgmr.msra.gmra.mxu1 %vm342_vm4, %v330_v30 }
 0x205   :  { %1568 = vmatprep.mubr.msk.f32.mxu1 %vm1850_vm0, %v1849_v0  ;;  %1565 = vmatpush3.msk.msra.mxu1 %vm574_vm10, %v422_v7 }
 0x206   :  { %1566 = vmatprep.subr.mxu1 %v1849_v0 }
 0x207   :  { %1567 = vmatpush3.msra.mxu1 %v421_v8 }
 0x208   :  { %1578 = vmatprep.subr.mxu1 %v1849_v0 }
 0x2c4   :  { %v412_v37 = vpop.f32.mrf.mxu1 }
 0x2c5   :  { %v413_v38 = vadd.f32 %v1432_v36, %v412_v37 }
 0x2c6   :  { %v1556_v39 = vpop.f32.mrf.mxu1 }
 0x2c7   :  { %v2095_v40 = vmax.f32 %v413_v38, 0.0 }
 0x2c9   :  { %1562 = vmatmul.mubr.msk.f32.vlgmr.msra.gmra.mxu0 %vm424_vm3, %v2095_v40  ;;  %v423_v41 = vmul.f32 %v2095_v40, %v2095_v40 }
 0x2ca   :  { %1575 = vmatprep.mubr.msk.f32.mxu0 %vm1850_vm0, %v1849_v0  ;;  %1572 = vmatpush3.xpose.msk.msra.mxu0 %vm424_vm3, %v651_v9 }
 0x2cb   :  { %v425_v42 = vsel %vm424_vm3, %v423_v41, 0.0  ;;  %1573 = vmatprep.subr.mxu0 %v1849_v0 }
 0x2cc   :  { %426 = vadd.xlane.f32.xlu1 %v425_v42 }
 0x2ce   :  { %1574 = vmatpush3.xpose.msk.msra.mxu0 %vm424_vm3, %v650_v17 }
 0x2cf   :  { %1599 = vmatprep.subr.mxu0 %v1849_v0 }
 0x355   :  { %v427_v54 = vpop.xlane.xlu1 %426 }
 0x356   :  { %v542_v56 = vadd.f32 %v528_v53, %v427_v54 }
 0x389   :  { %v512_v55 = vpop.f32.mrf.mxu0 }
 0x38a   :  { %v543_v57 = vmul.f32 2.0, %v512_v55 }
 0x38b   :  { %v1563_v58 = vpop.f32.mrf.mxu0 }
 0x38c   :  { %v544_v59 = vsub.f32 %v542_v56, %v543_v57 }
 0x38e   :  { %v546_v60 = vsel %vm545_vm7, %v544_v59, inf }
 0x38f   :  { %547 = vmin.xlane.f32.xlu1 %v546_v60  ;;  %v870_v60 = vld [vmem:[%s2299_s11 + $0x8] sm:$0xf] }
 0x418   :  { %v548_v61 = vpop.xlane.xlu1 %547 }
 0x419   :  { %vm549_vm8 = vcmp.eq.f32.partialorder %v544_v59, %v548_v61 }
 0x41a   :  { %v550_v62 = vsel %vm549_vm8, %v2104_v44, 12 }
 0x41b   :  { %v551_v63 = vsel %vm545_vm7, %v550_v62, 2147483647  ;;  %v869_v62 = vld [vmem:[%s2299_s11] sm:$0xff] }
 0x41c   :  { %v553_v1 = vshra.s32 %v551_v63, 16  ;;  %v552_v3 = vand.u32 65535, %v551_v63  ;;  %v877_v63 = vmul.f32 %v869_v62, %v869_v62 }
 0x41e   :  { %v555_v2 = vcvt.s32.f32 %v553_v1  ;;  %v554_v5 = vcvt.s32.f32 %v552_v3  ;;  %v878_v1 = vmul.f32 %v870_v60, %v870_v60 }
 0x420   :  { %556 = vmin.xlane.f32.xlu0 %v555_v2  ;;  %v882_v3 = vsel %vm433_vm5, %v878_v1, 0.0  ;;  %v1452_v1 = vld [vmem:[#allocation11] ss:$0 sm:$0xff] }
 0x424   :  { %661 = vadd.xlane.f32.xlu0 %v660_v20 }
 0x4a9   :  { %v557_v4 = vpop.xlane.xlu0 %556 }
 0x4aa   :  { %vm558_vm9 = vcmp.eq.f32.partialorder %v555_v2, %v557_v4  ;;  %v563_v10 = vcvt.f32.s32 %v557_v4  ;;  %v879_v2 = vsel %vm424_vm3, %v877_v63, 0.0 }
 0x4ab   :  { %v559_v6 = vsel %vm558_vm9, %v554_v5, inf  ;;  %vm1005_vm9 = vcmp.eq.s32.totalorder %v2104_v44, 2 }
 0x4ac   :  { %560 = vmin.xlane.f32.xlu1 %v559_v6  ;;  %v564_v13 = vshll.u32 %v563_v10, 16 }
 0x4ad   :  { %v662_v27 = vpop.xlane.xlu0 %661 }
 0x4ae   :  { %v750_v29 = vrot.slane %v662_v27, %v2108_v48 }
 0x4b0   :  { %664 = vadd.xlane.f32.xlu1 %v663_v21 }
 0x535   :  { %v561_v11 = vpop.xlane.xlu1 %560 }
 0x536   :  { %v562_v14 = vcvt.f32.s32 %v561_v11 }
 0x538   :  { %v565_v15 = vadd.s32 %v564_v13, %v562_v14 }
 0x539   :  { %v665_v28 = vpop.xlane.xlu1 %664 }
 0x53a   :  { %vm568_vm11 = vcmp.eq.s32.totalorder %v2104_v44, %v565_v15  ;;  %v754_v30 = vrot.slane %v665_v28, %v2110_v49  ;;  %v567_v58 = vsel %vm566_vm14, %v565_v15, 0 }
 0x53b   :  { %v1437_v16 = vsel %vm568_vm11, 1.0, %v1849_v0 }
 0x53c   :  { %1569 = vmatmul.mubr.msk.f32.vlgmr.msra.gmra.mxu1 %vm545_vm7, %v1437_v16  ;;  %v755_v32 = vsel %vm527_vm6, %v754_v30, %v750_v29  ;;  %v872_v30 = vld [vmem:[%s2300_s12 + $0x8] sm:$0xf] }
 0x53d   :  { %1582 = vmatprep.mubr.msk.f32.mxu1 %vm1850_vm0, %v1849_v0  ;;  %1579 = vmatpush3.msk.msra.mxu1 %vm574_vm10, %v653_v51  ;;  %v1194_v51 = vld [vmem:[%s2303_s15 + $0x18] sm:$0xff] }
 0x53e   :  { %1580 = vmatprep.subr.mxu1 %v1849_v0 }
 0x53f   :  { %1581 = vmatpush3.msra.mxu1 %v652_v52  ;;  %v1192_v52 = vld [vmem:[%s2303_s15 + $0x8] sm:$0xff] }
 0x540   :  { %1585 = vmatprep.subr.mxu1 %v1849_v0 }
 0x5fc   :  { %v2144_v22 = vpop.f32.mrf.mxu1 }
 0x5fd   :  { %v2148_v23 = vsub.f32 %v2095_v40, %v2144_v22 }
 0x5fe   :  { %v1570_v24 = vpop.f32.mrf.mxu1 }
 0x5ff   :  { %1576 = vmatmul.mubr.msk.f32.vlgmr.msra.gmra.mxu0 %vm424_vm3, %v2148_v23  ;;  %v654_v25 = vmul.f32 %v2148_v23, %v2148_v23 }
 0x600   :  { %1603 = vmatprep.mubr.msk.f32.mxu0 %vm1850_vm0, %v1849_v0 }
 0x601   :  { %v655_v26 = vsel %vm424_vm3, %v654_v25, 0.0 }
 0x602   :  { %656 = vadd.xlane.f32.xlu0 %v655_v26 }
 0x68b   :  { %v657_v31 = vpop.xlane.xlu0 %656 }
 0x68c   :  { %v763_v34 = vadd.f32 %v755_v32, %v657_v31  ;;  %v871_v31 = vld [vmem:[%s2300_s12] sm:$0xff]  ;;  %v1109_v32 = vld [vmem:[#allocation9 + $0x8] sm:$0xff] }
 0x68d   :  { %1600 = vmatpush3.msra.mxu0 %v1109_v32 }
 0x68e   :  { %1601 = vmatprep.subr.mxu0 %v1849_v0 }
 0x6bf   :  { %v741_v33 = vpop.f32.mrf.mxu0 }
 0x6c0   :  { %v764_v35 = vmul.f32 2.0, %v741_v33 }
 0x6c1   :  { %v1577_v36 = vpop.f32.mrf.mxu0 }
 0x6c2   :  { %v765_v37 = vsub.f32 %v763_v34, %v764_v35 }
 0x6c4   :  { %v766_v38 = vsel %vm545_vm7, %v765_v37, inf }
 0x6c5   :  { %767 = vmin.xlane.f32.xlu1 %v766_v38 }
 0x74e   :  { %v768_v39 = vpop.xlane.xlu1 %767 }
 0x74f   :  { %vm769_vm12 = vcmp.eq.f32.partialorder %v765_v37, %v768_v39 }
 0x750   :  { %v770_v40 = vsel %vm769_vm12, %v2104_v44, 12 }
 0x751   :  { %v771_v41 = vsel %vm545_vm7, %v770_v40, 2147483647  ;;  %v1108_v40 = vld [vmem:[#allocation9] sm:$0xff] }
 0x752   :  { %v773_v42 = vshra.s32 %v771_v41, 16  ;;  %v772_v45 = vand.u32 65535, %v771_v41  ;;  %1602 = vmatpush3.msra.mxu0 %v1108_v40 }
 0x753   :  { %1617 = vmatprep.subr.mxu0 %v1849_v0 }
 0x754   :  { %v775_v43 = vcvt.s32.f32 %v773_v42  ;;  %v774_v47 = vcvt.s32.f32 %v772_v45 }
 0x756   :  { %776 = vmin.xlane.f32.xlu0 %v775_v43 }
 0x75a   :  { %880 = vadd.xlane.f32.xlu0 %v879_v2 }
 0x7df   :  { %v777_v46 = vpop.xlane.xlu0 %776 }
 0x7e0   :  { %vm778_vm13 = vcmp.eq.f32.partialorder %v775_v43, %v777_v46  ;;  %v783_v53 = vcvt.f32.s32 %v777_v46 }
 0x7e1   :  { %v779_v50 = vsel %vm778_vm13, %v774_v47, inf }
 0x7e2   :  { %780 = vmin.xlane.f32.xlu1 %v779_v50  ;;  %v784_v55 = vshll.u32 %v783_v53, 16  ;;  %v1191_v53 = vld [vmem:[%s2303_s15] sm:$0xff] }
 0x7e3   :  { %v881_v9 = vpop.xlane.xlu0 %880 }
 0x7e4   :  { %v969_v11 = vrot.slane %v881_v9, %v2108_v48  ;;  %v1454_v9 = vld [vmem:[#allocation12] ss:$0 sm:$0xff] }
 0x7e6   :  { %883 = vadd.xlane.f32.xlu1 %v882_v3 }
 0x86b   :  { %v781_v54 = vpop.xlane.xlu1 %780 }
 0x86c   :  { %v782_v56 = vcvt.f32.s32 %v781_v54  ;;  %v1281_v54 = vld [vmem:[%s2305_s17 + $0x28] sm:$0xff] }
 0x86e   :  { %v785_v57 = vadd.s32 %v784_v55, %v782_v56  ;;  %v1280_v55 = vld [vmem:[%s2305_s17 + $0x20] sm:$0xff]  ;;  %v1279_v56 = vld [vmem:[%s2305_s17 + $0x18] sm:$0xff] }
 0x86f   :  { %v884_v10 = vpop.xlane.xlu1 %883 }
 0x870   :  { %v2174_v59 = vsel %vm786_vm15, %v785_v57, %v567_v58  ;;  %vm788_vm8 = vcmp.eq.s32.totalorder %v2104_v44, %v785_v57  ;;  %v973_v13 = vrot.slane %v884_v10, %v2110_v49 }
 0x871   :  { %v1443_v61 = vsel %vm788_vm8, 1.0, %v1849_v0 }
 0x872   :  { %1583 = vmatmul.mubr.msk.f32.vlgmr.msra.gmra.mxu1 %vm545_vm7, %v1443_v61  ;;  %v974_v15 = vsel %vm527_vm6, %v973_v13, %v969_v11 }
 0x873   :  { %1586 = vmatpush3.xpose.msk.msra.mxu1 %vm424_vm3, %v870_v60  ;;  %1589 = vmatprep.mubr.msk.f32.mxu1 %vm1850_vm0, %v1849_v0 }
 0x874   :  { %1587 = vmatprep.subr.mxu1 %v1849_v0 }
 0x877   :  { %1588 = vmatpush3.xpose.msk.msra.mxu1 %vm424_vm3, %v869_v62 }
 0x878   :  { %1592 = vmatprep.subr.mxu1 %v1849_v0 }
 0x932   :  { %v863_v4 = vpop.f32.mrf.mxu1 }
 0x933   :  { %v2194_v5 = vsub.f32 %v2148_v23, %v863_v4  ;;  %v868_v41 = vadd.f32 %v863_v4, %v2144_v22  ;;  %v1193_v22 = vld [vmem:[%s2303_s15 + $0x10] sm:$0xff] }
 0x934   :  { %v1584_v6 = vpop.f32.mrf.mxu1 }
 0x935   :  { %1590 = vmatmul.mubr.msk.f32.vlgmr.msra.gmra.mxu1 %vm424_vm3, %v2194_v5  ;;  %v873_v7 = vmul.f32 %v2194_v5, %v2194_v5  ;;  %v1278_v6 = vld [vmem:[%s2305_s17 + $0x10] sm:$0xff] }
 0x936   :  { %1596 = vmatprep.mubr.msk.f32.mxu1 %vm1850_vm0, %v1849_v0  ;;  %1593 = vmatpush3.msk.msra.mxu1 %vm574_vm10, %v872_v30  ;;  %vm1088_vm10 = vcmask 23552  }
 0x937   :  { %v874_v8 = vsel %vm424_vm3, %v873_v7, 0.0  ;;  %1594 = vmatprep.subr.mxu1 %v1849_v0  ;;  %v1277_v7 = vld [vmem:[%s2305_s17 + $0x8] sm:$0xff] }
 0x938   :  { %875 = vadd.xlane.f32.xlu0 %v874_v8  ;;  %1595 = vmatpush3.msra.mxu1 %v871_v31  ;;  %v1276_v8 = vld [vmem:[%s2305_s17] sm:$0xff]  ;;  %s1851_s17 = smov [#allocation15]  }
 0x939   :  { %1606 = vmatprep.subr.mxu1 %v1849_v0  ;;  %s1387_s27 = sshll.u32 %s1851_s17, 4  ;;  %s1388_s27 = int_to_ptr.vmem [resolvable:$true] %s1387_s27 }
 0x93a   :  { %s1790_s29 = scalar_lea.vmem %s1388_s27, 128  ;;  %p1795_p8 = scmp.lt.s32.totalorder %s1388_s27, %s1388_s27 }
 0x93b   :  { %p1791_p7 = scmp.ne.s32.totalorder %s1388_s27, %s1790_s29  ;;  %p1796_p9 = scmp.lt.s32.totalorder %s1790_s29, %s1790_s29 }
 0x93d   :  { %p1797_p10 = por %p1796_p9, %p1795_p8 }
 0x93f   :  { %p1798_p11 = pnand %p1797_p10, %p1791_p7 }
 0x9c1   :  { %v876_v14 = vpop.xlane.xlu0 %875 }
 0x9c2   :  { %v982_v17 = vadd.f32 %v974_v15, %v876_v14  ;;  %v1456_v15 = vld [vmem:[#allocation14] ss:$0 sm:$0xff] }
 0x9f5   :  { %v960_v16 = vpop.f32.mrf.mxu1 }
 0x9f6   :  { %v983_v18 = vmul.f32 2.0, %v960_v16 }
 0x9f7   :  { %v1591_v19 = vpop.f32.mrf.mxu1 }
 0x9f8   :  { %v984_v20 = vsub.f32 %v982_v17, %v983_v18 }
 0x9fa   :  { %v985_v21 = vsel %vm545_vm7, %v984_v20, inf }
 0x9fb   :  { %986 = vmin.xlane.f32.xlu1 %v985_v21 }
 0xa84   :  { %v987_v23 = vpop.xlane.xlu1 %986 }
 0xa85   :  { %vm988_vm5 = vcmp.eq.f32.partialorder %v984_v20, %v987_v23 }
 0xa86   :  { %v989_v24 = vsel %vm988_vm5, %v2104_v44, 12 }
 0xa87   :  { %v990_v25 = vsel %vm545_vm7, %v989_v24, 2147483647 }
 0xa88   :  { %v992_v48 = vshra.s32 %v990_v25, 16  ;;  %v991_v49 = vand.u32 65535, %v990_v25 }
 0xa8a   :  { %v994_v26 = vcvt.s32.f32 %v992_v48  ;;  %v993_v28 = vcvt.s32.f32 %v991_v49 }
 0xa8c   :  { %995 = vmin.xlane.f32.xlu0 %v994_v26 }
 0xb15   :  { %v996_v27 = vpop.xlane.xlu0 %995 }
 0xb16   :  { %vm997_vm6 = vcmp.eq.f32.partialorder %v994_v26, %v996_v27  ;;  %v1002_v33 = vcvt.f32.s32 %v996_v27 }
 0xb17   :  { %v998_v29 = vsel %vm997_vm6, %v993_v28, inf }
 0xb18   :  { %999 = vmin.xlane.f32.xlu1 %v998_v29  ;;  %v1003_v35 = vshll.u32 %v1002_v33, 16 }
 0xba1   :  { %v1000_v34 = vpop.xlane.xlu1 %999 }
 0xba2   :  { %v1001_v36 = vcvt.f32.s32 %v1000_v34 }
 0xba4   :  { %v1004_v37 = vadd.s32 %v1003_v35, %v1001_v36 }
 0xba6   :  { %v1006_v38 = vsel %vm1005_vm9, %v1004_v37, %v2174_v59  ;;  %vm1007_vm11 = vcmp.eq.s32.totalorder %v2104_v44, %v1004_v37 }
 0xba7   :  { %v1449_v39 = vsel %vm1007_vm11, 1.0, %v1849_v0  ;;  %1089 = vst.msk [vmem:[%s2308_s20] sm:$0xff] %vm1088_vm10, %v1006_v38 }
 0xba8   :  { %1597 = vmatmul.mubr.msk.f32.vlgmr.msra.gmra.mxu1 %vm545_vm7, %v1449_v39 }
 0xba9   :  { %1614 = vmatprep.mubr.msk.f32.mxu1 %vm1850_vm0, %v1849_v0  ;;  %1607 = vmatpush3.msra.mxu1 %v1194_v51 }
 0xbaa   :  { %1608 = vmatprep.subr.mxu1 %v1849_v0 }
 0xbab   :  { %1609 = vmatpush3.msra.mxu1 %v1193_v22 }
 0xbac   :  { %1610 = vmatprep.subr.mxu1 %v1849_v0 }
 0xbad   :  { %1611 = vmatpush3.msra.mxu1 %v1192_v52 }
 0xbae   :  { %1612 = vmatprep.subr.mxu1 %v1849_v0 }
 0xbaf   :  { %1613 = vmatpush3.msra.mxu1 %v1191_v53 }
 0xc68   :  { %v1082_v42 = vpop.f32.mrf.mxu1 }
 0xc69   :  { %v1086_v44 = vsub.f32 %v2194_v5, %v1082_v42  ;;  %v1087_v43 = vadd.f32 %v1082_v42, %v868_v41 }
 0xc6a   :  { %v1598_v45 = vpop.f32.mrf.mxu1 }
 0xc6b   :  { %1604 = vmatmul.mubr.msk.f32.vlgmr.msra.gmra.mxu0 %vm424_vm3, %v1087_v43  ;;  %v1090_v46 = vsub.f32 %v1086_v44, %v1087_v43 }
 0xc6c   :  { %1629 = vmatprep.mubr.msk.f32.mxu0 %vm1850_vm0, %v1849_v0  ;;  %1618 = vmatpush3.msra.mxu0 %v1281_v54 }
 0xc6d   :  { %v1091_v47 = vmul.f32 %v1090_v46, %v1090_v46  ;;  %1619 = vmatprep.subr.mxu0 %v1849_v0 }
 0xc6e   :  { %1620 = vmatpush3.msra.mxu0 %v1280_v55 }
 0xc6f   :  { %v1092_v50 = vsel %vm424_vm3, %v1091_v47, 0.0  ;;  %1621 = vmatprep.subr.mxu0 %v1849_v0 }
 0xc70   :  { %1093 = vadd.xlane.f32.xlu0 %v1092_v50  ;;  %1622 = vmatpush3.msra.mxu0 %v1279_v56 }
 0xc71   :  { %1623 = vmatprep.subr.mxu0 %v1849_v0 }
 0xc72   :  { %1624 = vmatpush3.msra.mxu0 %v1278_v6 }
 0xc73   :  { %1625 = vmatprep.subr.mxu0 %v1849_v0 }
 0xc74   :  { %1626 = vmatpush3.msra.mxu0 %v1277_v7 }
 0xc75   :  { %1627 = vmatprep.subr.mxu0 %v1849_v0 }
 0xc76   :  { %1628 = vmatpush3.msra.mxu0 %v1276_v8 }
 0xcf9   :  { %v1094_v57 = vpop.xlane.xlu0 %1093 }
 0xcfa   :  { %v1095_v58 = vrot.slane %v1094_v57, 4 }
 0xcfc   :  { %v1096_v59 = vadd.f32 %v1095_v58, %v1094_v57 }
 0xcfe   :  { %v1097_v60 = vrot.slane %v1096_v59, 2 }
 0xd00   :  { %v1098_v61 = vadd.f32 %v1097_v60, %v1096_v59 }
 0xd02   :  { %v1099_v62 = vrot.slane %v1098_v61, 1 }
 0xd04   :  { %v1100_v63 = vadd.f32 %v1099_v62, %v1098_v61 }
 0xd06   :  { %1632 = vpush %v1100_v63 }
 0xd2b   :  { %v1186_v2 = vpop.f32.mrf.mxu0 }
 0xd2c   :  { %v1187_v3 = vadd.f32 %v1452_v1, %v1186_v2 }
 0xd2d   :  { %v1605_v4 = vpop.f32.mrf.mxu0 }
 0xd2e   :  { %v1190_v5 = vmax.f32 %v1187_v3, 0.0 }
 0xd30   :  { %1615 = vmatmul.mubr.msk.f32.vlgmr.msra.gmra.mxu1 %vm342_vm4, %v1190_v5 }
 0xd37   :  { %s1633_s15 = spop %1632 }
 0xd38   :  { %s1104_s6 = smul.f32 0.0078125, %s1633_s15 }
 0xd3a   :  { %s1105_s25 = smul.f32 3.75, %s1104_s6 }
 0xd3c   :  { %1107 = sst [smem:[#allocation17]] %s1105_s25 }
 0xdf0   :  { %v1271_v10 = vpop.f32.mrf.mxu1 }
 0xdf1   :  { %v1272_v11 = vadd.f32 %v1454_v9, %v1271_v10 }
 0xdf2   :  { %v1616_v13 = vpop.f32.mrf.mxu1 }
 0xdf3   :  { %v1275_v14 = vmax.f32 %v1272_v11, 0.0 }
 0xdf5   :  { %1630 = vmatmul.mubr.msk.f32.vlgmr.msra.gmra.mxu0 %vm256_vm2, %v1275_v14 }
 0xeb5   :  { %v1358_v16 = vpop.f32.mrf.mxu0 }
 0xeb6   :  { %v1359_v17 = vadd.f32 %v1456_v15, %v1358_v16 }
 0xeb7   :  { %v1631_v18 = vpop.f32.mrf.mxu0 }
 0xeb8   :  { %v1362_v19 = vmax.f32 %v1359_v17, 0.0 }
 0xeba   :  { %1363 = vst.msk [vmem:[#allocation15] sm:$0xff] %vm168_vm1, %v1362_v19  ;;  %v1364_v0 = vsub.f32 %v1362_v19, %v2041_v12 }
 0xebc   :  { %v1365_v20 = vmul.f32 %v1364_v0, %v1364_v0 }
 0xebe   :  { %v1366_v21 = vsel %vm168_vm1, %v1365_v20, 0.0 }
 0xebf   :  { %1367 = vadd.xlane.f32.xlu1 %v1366_v21 }
 0xec0   :  { %1801 = shalt.err (!%p1798_p11)
}
 0xec1   :  { %1390 = dma.vmem_to_hbm [thread:$0]  %s1388_s27, 128, %s2307_s19, [#allocation4]  }
 0xec2   :  { %s1852_s20 = smov [#allocation17]   ;;  %s1853_s4 = smov [#allocation16]  }
 0xec3   :  { %1408 = dma.smem_to_hbm %s1852_s20, 16, %s2310_s22, [#allocation18]  }
 0xf48   :  { %v1368_v12 = vpop.xlane.xlu1 %1367 }
 0xf49   :  { %v1369_v23 = vrot.slane %v1368_v12, 4 }
 0xf4b   :  { %v1370_v24 = vadd.f32 %v1369_v23, %v1368_v12 }
 0xf4d   :  { %v1371_v25 = vrot.slane %v1370_v24, 2 }
 0xf4f   :  { %v1372_v48 = vadd.f32 %v1371_v25, %v1370_v24 }
 0xf51   :  { %v1373_v26 = vrot.slane %v1372_v48, 1 }
 0xf53   :  { %v1374_v49 = vadd.f32 %v1373_v26, %v1372_v48 }
 0xf55   :  { %1634 = vpush %v1374_v49 }
 0xf86   :  { %s1635_s0 = spop %1634 }
 0xf87   :  { %s1378_s7 = smul.f32 0.001953125, %s1635_s0 }
 0xf89   :  { %1380 = sst [smem:[#allocation16]] %s1378_s7 }
 0xf8a   :  { %1400 = dma.smem_to_hbm %s1853_s4, 16, %s2309_s21, [#allocation5]  }
 0xf8b   :  { %1834 = dma.done.wait [#allocation4], 128  }
 0xf8c   :  { %1835 = vsyncadd [#allocation4], 4294967168 }
 0xf8d   :  { %1836 = dma.done.wait [#allocation5], 16  }
 0xf8e   :  { %1837 = vsyncadd [#allocation5], 4294967280 }
 0xf8f   :  { %1838 = dma.done.wait [#allocation18], 16  }
 0xf90   :  { %1839 = vsyncadd [#allocation18], 4294967280 }
 0xf91   :  { %1420 = sfence }
 0xf92   :  { %1421 = vsyncpa [#allocation3], 1 }
 0xf93   :  { %1422 = vsyncpa [#allocation7], 1 }
 0xf94   :  { %1423 = vsyncpa [#allocation10], 1 }
 0xf95   :  { %1424 = vsyncpa [#allocation13], 1 }
 0xf96   :  { %1425 = vsyncpa [#allocation4], 1 }
 0xf97   :  { %1426 = vsyncpa [#allocation5], 1 }
 0xf98   :  { %1427 = vsyncpa [#allocation18], 1 }

</bundles_post_ra>
